<compile_context>
chip_gen: v5e
topology: v5e:2x2
jax: 0.10.0
libtpu: 0.0.40
codegen_flags: <defaults>
</compile_context>

<pallas_src>
import jax
import jax.numpy as jnp
from jax.experimental import pallas as pl
from jax.experimental.pallas import tpu as pltpu

IN_FEATURES = 784
OUT_FEATURES = 10
N_PAD = 128            # lane-dense padded output width
MAX_BLOCK_B = 1024     # batch tile (rows); sized for v7x's 32 MiB scoped VMEM
NEG_INF = -1e30        # big-negative mask value for padded columns


def linear_swish_kernel(x_ref, w_ref, b_ref, o_ref):
    # x_ref: (TB, 784) bf16 ; w_ref: (784, 128) bf16 ; b_ref: (1, 128) f32
    # o_ref: (TB, 128) f32
    # Linear: bf16 operands on the MXU, f32 accumulation; bias add in f32.
    z = jnp.dot(x_ref[...], w_ref[...],
                preferred_element_type=jnp.float32) + b_ref[...]

    # Swish: z * sigmoid(z)  (f32 on the VPU/EUP)
    s = z * jax.nn.sigmoid(z)

    # Mask padded feature columns (>=10) so they don't perturb the softmax
    # denominator (padded z == 0 -> swish == 0 -> would add exp(0 - m)).
    col = jax.lax.broadcasted_iota(jnp.int32, s.shape, dimension=1)
    s = jnp.where(col < OUT_FEATURES, s, NEG_INF)

    # Numerically stable log_softmax over the feature axis.
    m = jnp.max(s, axis=1, keepdims=True)
    e = s - m
    lse = jnp.log(jnp.sum(jnp.exp(e), axis=1, keepdims=True))
    o_ref[...] = (e - lse).astype(o_ref.dtype)


def linear_swish_forward(x, weight, bias):
    """x: any shape flattening to (B, 784) (e.g. (B, 1, 28, 28)).
    weight: (10, 784) PyTorch layout. bias: (10,). Returns (B, 10) f32."""
    x2d = x.reshape(-1, IN_FEATURES).astype(jnp.float32)
    B = x2d.shape[0]

    # Batch tile: multiple of 8 sublanes, capped at MAX_BLOCK_B.
    TB = min(MAX_BLOCK_B, max(8, ((B + 7) // 8) * 8))
    B_pad = ((B + TB - 1) // TB) * TB
    if B_pad != B:
        x2d = jnp.pad(x2d, ((0, B_pad - B), (0, 0)))

    # bf16 matmul operands (f32 accumulation inside the kernel).
    x_bf16 = x2d.astype(jnp.bfloat16)

    # Pad W^T (784, 10) -> (784, 128) and bias (1, 10) -> (1, 128) with zeros.
    w_t = weight.astype(jnp.float32).T
    w_pad = jnp.zeros((IN_FEATURES, N_PAD), jnp.float32)
    w_pad = w_pad.at[:, :OUT_FEATURES].set(w_t).astype(jnp.bfloat16)
    b_pad = jnp.zeros((1, N_PAD), jnp.float32)
    b_pad = b_pad.at[:, :OUT_FEATURES].set(
        bias.astype(jnp.float32).reshape(1, OUT_FEATURES))

    grid = (B_pad // TB,)
    out_pad = pl.pallas_call(
        linear_swish_kernel,
        out_shape=jax.ShapeDtypeStruct((B_pad, N_PAD), jnp.float32),
        grid=grid,
        in_specs=[
            pl.BlockSpec((TB, IN_FEATURES), lambda i: (i, 0)),     # streamed
            pl.BlockSpec((IN_FEATURES, N_PAD), lambda i: (0, 0)),  # resident
            pl.BlockSpec((1, N_PAD), lambda i: (0, 0)),            # resident
        ],
        out_specs=pl.BlockSpec((TB, N_PAD), lambda i: (i, 0)),
        compiler_params=pltpu.CompilerParams(
            dimension_semantics=("parallel",)),
        cost_estimate=pl.CostEstimate(
            flops=2 * B_pad * IN_FEATURES * OUT_FEATURES,
            transcendentals=2 * B_pad * OUT_FEATURES,
            bytes_accessed=(B_pad * IN_FEATURES * 2      # x (bf16)
                            + IN_FEATURES * N_PAD * 2    # W (bf16)
                            + N_PAD * 4                  # bias (f32)
                            + B_pad * N_PAD * 4)),       # output (f32)
    )(x_bf16, w_pad, b_pad)

    # Drop padded rows / columns.
    return out_pad[:B, :OUT_FEATURES]


def reference_forward(x, weight, bias):
    x2d = x.reshape(-1, IN_FEATURES).astype(jnp.float32)
    z = x2d @ weight.astype(jnp.float32).T + bias.astype(jnp.float32)
    s = z * jax.nn.sigmoid(z)
    return jax.nn.log_softmax(s, axis=1)


if __name__ == "__main__":
    key = jax.random.PRNGKey(0)
    kx, kw, kb = jax.random.split(key, 3)

    # MNIST-like input, small batch.
    B = 2
    x = jax.random.normal(kx, (B, 1, 28, 28), dtype=jnp.float32)

    # PyTorch-style init: U(-1/sqrt(784), 1/sqrt(784)).
    bound = 1.0 / (IN_FEATURES ** 0.5)
    weight = jax.random.uniform(
        kw, (OUT_FEATURES, IN_FEATURES), minval=-bound, maxval=bound,
        dtype=jnp.float32)
    bias = jax.random.uniform(
        kb, (OUT_FEATURES,), minval=-bound, maxval=bound, dtype=jnp.float32)

    out = linear_swish_forward(x, weight, bias)
    out = jax.block_until_ready(out)

    ref = reference_forward(x, weight, bias)
    assert out.shape == (B, OUT_FEATURES)
    # Tolerance relaxed vs f32 reference: matmul operands are bf16
    # (accumulation stays f32), so only input-rounding error remains.
    assert jnp.allclose(out, ref, atol=5e-2, rtol=5e-2), "mismatch vs reference"

    print("KERNEL_OK")
</pallas_src>

<mosaic_0001>
module attributes {stable_mosaic.version = 11 : i64} {
  func.func @linear_swish_kernel(%arg0: i32, %arg1: memref<8x784xbf16, #tpu.memory_space<vmem>>, %arg2: memref<784x128xbf16, #tpu.memory_space<vmem>>, %arg3: memref<1x128xf32, #tpu.memory_space<vmem>>, %arg4: memref<8x128xf32, #tpu.memory_space<vmem>>) attributes {dimension_semantics = [#tpu.dimension_semantics<parallel>], iteration_bounds = array<i64: 1>, scalar_prefetch = 0 : i64, scratch_operands = 0 : i64, tpu.core_type = #tpu.core_type<tc>, window_params = [{transform_indices = @transform_0, window_bounds = array<i64: 8, 784>}, {pipeline_mode = #tpu.pipeline_mode<synchronous>, transform_indices = @transform_1, window_bounds = array<i64: 784, 128>}, {pipeline_mode = #tpu.pipeline_mode<synchronous>, transform_indices = @transform_2, window_bounds = array<i64: 1, 128>}, {transform_indices = @transform_3, window_bounds = array<i64: 8, 128>}]} {
    %c0 = arith.constant 0 : index
    %c0_0 = arith.constant 0 : index
    %0 = vector.load %arg1[%c0, %c0_0] : memref<8x784xbf16, #tpu.memory_space<vmem>>, vector<8x784xbf16>
    %c0_1 = arith.constant 0 : index
    %c0_2 = arith.constant 0 : index
    %1 = vector.load %arg2[%c0_1, %c0_2] : memref<784x128xbf16, #tpu.memory_space<vmem>>, vector<784x128xbf16>
    %cst = arith.constant dense<0.000000e+00> : vector<8x128xf32>
    %2 = tpu.matmul %0, %1, %cst {dimension_numbers = #tpu.dot_dimension_numbers<[1], [0], [0], [1], [0, 0, 1, 1], [], []>} : vector<8x784xbf16>, vector<784x128xbf16>, vector<8x128xf32> -> vector<8x128xf32>
    %c0_3 = arith.constant 0 : index
    %c0_4 = arith.constant 0 : index
    %3 = vector.load %arg3[%c0_3, %c0_4] : memref<1x128xf32, #tpu.memory_space<vmem>>, vector<1x128xf32>
    %4 = vector.broadcast %3 : vector<1x128xf32> to vector<8x128xf32>
    %5 = arith.addf %2, %4 : vector<8x128xf32>
    %6 = arith.negf %5 : vector<8x128xf32>
    %7 = math.exp %6 : vector<8x128xf32>
    %cst_5 = arith.constant 1.000000e+00 : f32
    %8 = vector.broadcast %cst_5 : f32 to vector<8x128xf32>
    %9 = arith.addf %8, %7 : vector<8x128xf32>
    %10 = arith.divf %8, %9 : vector<8x128xf32>
    %11 = arith.mulf %5, %10 : vector<8x128xf32>
    %12 = tpu.iota {dimensions = array<i32: 1>} : vector<8x128xi32>
    %c10_i32 = arith.constant 10 : i32
    %13 = vector.broadcast %c10_i32 : i32 to vector<8x128xi32>
    %14 = arith.cmpi slt, %12, %13 : vector<8x128xi32>
    %cst_6 = arith.constant -1.000000e+30 : f32
    %15 = vector.broadcast %cst_6 : f32 to vector<8x128xf32>
    %16 = arith.select %14, %11, %15 : vector<8x128xi1>, vector<8x128xf32>
    %cst_7 = arith.constant dense<0xFF800000> : vector<8xf32>
    %17 = vector.multi_reduction <maximumf>, %16, %cst_7 [1] : vector<8x128xf32> to vector<8xf32>
    %18 = vector.shape_cast %17 : vector<8xf32> to vector<8x1xf32>
    %19 = vector.broadcast %18 : vector<8x1xf32> to vector<8x128xf32>
    %20 = arith.subf %16, %19 : vector<8x128xf32>
    %21 = math.exp %20 : vector<8x128xf32>
    %cst_8 = arith.constant dense<0.000000e+00> : vector<8xf32>
    %22 = vector.multi_reduction <add>, %21, %cst_8 [1] : vector<8x128xf32> to vector<8xf32>
    %23 = vector.shape_cast %22 : vector<8xf32> to vector<8x1xf32>
    %24 = math.log %23 : vector<8x1xf32>
    %25 = vector.broadcast %24 : vector<8x1xf32> to vector<8x128xf32>
    %26 = arith.subf %20, %25 : vector<8x128xf32>
    %c0_9 = arith.constant 0 : index
    %c0_10 = arith.constant 0 : index
    %27 = vector.load %arg4[%c0_9, %c0_10] : memref<8x128xf32, #tpu.memory_space<vmem>>, vector<8x128xf32>
    tpu.vector_store %arg4[%c0_9, %c0_10], %26 {strides = array<i32>} : memref<8x128xf32, #tpu.memory_space<vmem>>, vector<8x128xf32>,
    return
  }
  func.func @transform_0(%arg0: i32) -> (i32, i32) {
    %c0_i32 = arith.constant 0 : i32
    %c0_i32_0 = arith.constant 0 : i32
    return %arg0, %c0_i32 : i32, i32
  }
  func.func @transform_1(%arg0: i32) -> (i32, i32) {
    %c0_i32 = arith.constant 0 : i32
    %c0_i32_0 = arith.constant 0 : i32
    %c0_i32_1 = arith.constant 0 : i32
    return %c0_i32, %c0_i32_0 : i32, i32
  }
  func.func @transform_2(%arg0: i32) -> (i32, i32) {
    %c0_i32 = arith.constant 0 : i32
    %c0_i32_0 = arith.constant 0 : i32
    %c0_i32_1 = arith.constant 0 : i32
    return %c0_i32, %c0_i32_0 : i32, i32
  }
  func.func @transform_3(%arg0: i32) -> (i32, i32) {
    %c0_i32 = arith.constant 0 : i32
    %c0_i32_0 = arith.constant 0 : i32
    return %arg0, %c0_i32 : i32, i32
  }
}

</mosaic_0001>

<bundles_post_ra>
// kernel: tpu_custom_call.1
= control target key start
LH: loop header
LB: loop body
LE: loop exit
PB: predicated region body
PF: predicated region fallthrough
CT: control target
= control target key end

     0   :  { %8 = vsyncpa [#allocation3], 0  ;;  %s994_s0 = inlined_call_operand.hbm [shape: bf16[8,784], index: 0, kind: input, shape index: {}]   ;;  %s995_s1 = inlined_call_operand.hbm [shape: bf16[784,128], index: 1, kind: input, shape index: {}]   ;;  %s996_s2 = inlined_call_operand.vmem [shape: f32[1,128], index: 2, kind: input, shape index: {}]   ;;  %s997_s3 = inlined_call_operand.hbm [shape: f32[8,128], index: 3, kind: output, shape index: {}]  }
   0x1   :  { %9 = vsyncpa [#allocation6], 0 }
   0x2   :  { %10 = vsyncpa [#allocation4], 0  ;;  %s16_s14 = sshll.u32 %s994_s0, 4  ;;  %s957_s15 = smov [#allocation2]   ;;  %s17_s14 = int_to_ptr.hbm [resolvable:$true] %s16_s14 }
   0x3   :  { %s18_s16 = sshll.u32 %s957_s15, 4  ;;  %s26_s19 = sshll.u32 %s995_s1, 4  ;;  %s19_s16 = int_to_ptr.vmem [resolvable:$true] %s18_s16  ;;  %s27_s19 = int_to_ptr.hbm [resolvable:$true] %s26_s19 }
   0x4   :  { %21 = dma.hbm_to_vmem [thread:$0]  %s17_s14, 448, %s19_s16, [#allocation3]  }
   0x5   :  { %s958_s20 = smov [#allocation5]   ;;  %s959_s22 = smov 64  }
   0x6   :  { %s28_s21 = sshll.u32 %s958_s20, 4  ;;  %s960_s23 = smov 4   ;;  %s29_s21 = int_to_ptr.vmem [resolvable:$true] %s28_s21 }
   0x7   :  { %34 = dma.hbm_to_vmem [thread:$0]  %s27_s19, 6272, %s29_s21, [#allocation6], %s959_s22, %s959_s22, %s960_s23  }
   0x8   :  { %951 = dma.done.wait [#allocation3], 448  }
   0x9   :  { %952 = vsyncadd [#allocation3], 4294966848 }
   0xa   :  { %953 = dma.done.wait [#allocation6], 6272  }
   0xb   :  { %954 = vsyncadd [#allocation6], 4294961024  ;;  %v823_v0 = vld [vmem:[#allocation5 + $0x38] sm:$0xff]  ;;  %v822_v3 = vld [vmem:[#allocation5 + $0x30] sm:$0xff]  ;;  %vm470_vm0 = vcmask 130048   ;;  %s607_s27 = sshll.u32 %s997_s3, 4  ;;  %s608_s27 = int_to_ptr.hbm [resolvable:$true] %s607_s27 }
   0xc   :  { %v831_v1 = vld [vmem:[#allocation5 + $0x78] sm:$0xff]  ;;  %474 = vmatpush.bf16.msra.mxu0 %v823_v0  ;;  %v830_v4 = vld [vmem:[#allocation5 + $0x70] sm:$0xff]  ;;  %v821_v8 = vld [vmem:[#allocation5 + $0x28] sm:$0xff] }
   0xd   :  { %v839_v2 = vld [vmem:[#allocation5 + $0xb8] sm:$0xff]  ;;  %487 = vmatpush.bf16.msra.mxu1 %v831_v1  ;;  %v838_v5 = vld [vmem:[#allocation5 + $0xb0] sm:$0xff]  ;;  %v829_v9 = vld [vmem:[#allocation5 + $0x68] sm:$0xff] }
   0xe   :  { %500 = vmatpush.bf16.msra.mxu2 %v839_v2  ;;  %v847_v6 = vld [vmem:[#allocation5 + $0xf8] sm:$0xff]  ;;  %v846_v7 = vld [vmem:[#allocation5 + $0xf0] sm:$0xff]  ;;  %v837_v10 = vld [vmem:[#allocation5 + $0xa8] sm:$0xff] }
   0xf   :  { %513 = vmatpush.bf16.msra.mxu3 %v847_v6  ;;  %v845_v11 = vld [vmem:[#allocation5 + $0xe8] sm:$0xff]  ;;  %v820_v12 = vld [vmem:[#allocation5 + $0x20] sm:$0xff]  ;;  %v819_v16 = vld [vmem:[#allocation5 + $0x18] sm:$0xff] }
  0x10   :  { %475 = vmatpush.bf16.msra.mxu0 %v822_v3  ;;  %v828_v13 = vld [vmem:[#allocation5 + $0x60] sm:$0xff]  ;;  %v827_v17 = vld [vmem:[#allocation5 + $0x58] sm:$0xff]  ;;  %v818_v20 = vld [vmem:[#allocation5 + $0x10] sm:$0xff] }
  0x11   :  { %488 = vmatpush.bf16.msra.mxu1 %v830_v4  ;;  %v836_v14 = vld [vmem:[#allocation5 + $0xa0] sm:$0xff]  ;;  %v835_v18 = vld [vmem:[#allocation5 + $0x98] sm:$0xff]  ;;  %v826_v21 = vld [vmem:[#allocation5 + $0x50] sm:$0xff] }
  0x12   :  { %501 = vmatpush.bf16.msra.mxu2 %v838_v5  ;;  %v844_v15 = vld [vmem:[#allocation5 + $0xe0] sm:$0xff]  ;;  %v843_v19 = vld [vmem:[#allocation5 + $0xd8] sm:$0xff]  ;;  %v834_v22 = vld [vmem:[#allocation5 + $0x90] sm:$0xff] }
  0x13   :  { %514 = vmatpush.bf16.msra.mxu3 %v846_v7  ;;  %v842_v23 = vld [vmem:[#allocation5 + $0xd0] sm:$0xff]  ;;  %v817_v24 = vld [vmem:[#allocation5 + $0x8] sm:$0xff]  ;;  %v816_v32 = vld [vmem:[#allocation5] sm:$0xff] }
  0x14   :  { %476 = vmatpush.bf16.msra.mxu0 %v821_v8  ;;  %v825_v25 = vld [vmem:[#allocation5 + $0x48] sm:$0xff]  ;;  %v824_v33 = vld [vmem:[#allocation5 + $0x40] sm:$0xff]  ;;  %v855_v34 = vld [vmem:[#allocation5 + $0x138] sm:$0xff] }
  0x15   :  { %489 = vmatpush.bf16.msra.mxu1 %v829_v9  ;;  %v46_v26 = vld [vmem:[#allocation2] sm:$0xff]  ;;  %v47_v28 = vld [vmem:[#allocation2 + $0x8] sm:$0xff]  ;;  %v863_v35 = vld [vmem:[#allocation5 + $0x178] sm:$0xff] }
  0x16   :  { %502 = vmatpush.bf16.msra.mxu2 %v837_v10  ;;  %v833_v27 = vld [vmem:[#allocation5 + $0x88] sm:$0xff]  ;;  %v156_v29 = vunpack.c.l.b16 %v46_v26  ;;  %v157_v31 = vunpack.c.h.b16 %v46_v26  ;;  %v832_v36 = vld [vmem:[#allocation5 + $0x80] sm:$0xff]  ;;  %v158_v37 = vunpack.c.l.b16 %v47_v28  ;;  %v159_v40 = vunpack.c.h.b16 %v47_v28  ;;  %v854_v43 = vld [vmem:[#allocation5 + $0x130] sm:$0xff] }
  0x17   :  { %515 = vmatpush.bf16.msra.mxu3 %v845_v11  ;;  %v841_v30 = vld [vmem:[#allocation5 + $0xc8] sm:$0xff]  ;;  %v840_v41 = vld [vmem:[#allocation5 + $0xc0] sm:$0xff]  ;;  %v862_v44 = vld [vmem:[#allocation5 + $0x170] sm:$0xff] }
  0x18   :  { %477 = vmatpush.bf16.msra.mxu0 %v820_v12  ;;  %v163_v38 = vpack.c.b16 %v156_v29, %v156_v29  ;;  %v164_v39 = vpack.c.b16 %v157_v31, %v157_v31  ;;  %v864_v42 = vld [vmem:[#allocation5 + $0x180] sm:$0xff]  ;;  %v165_v45 = vpack.c.b16 %v158_v37, %v158_v37  ;;  %v166_v46 = vpack.c.b16 %v159_v40, %v159_v40  ;;  %v853_v47 = vld [vmem:[#allocation5 + $0x128] sm:$0xff]  ;;  %v49_v51 = vld [vmem:[#allocation2 + $0x18] sm:$0xf] }
  0x19   :  { %490 = vmatpush.bf16.msra.mxu1 %v828_v13  ;;  %v861_v48 = vld [vmem:[#allocation5 + $0x168] sm:$0xff]  ;;  %v852_v49 = vld [vmem:[#allocation5 + $0x120] sm:$0xff]  ;;  %v851_v52 = vld [vmem:[#allocation5 + $0x118] sm:$0xff]  ;;  %v162_v54 = vunpack.c.l.b16 %v49_v51 }
  0x1a   :  { %503 = vmatpush.bf16.msra.mxu2 %v836_v14  ;;  %v860_v50 = vld [vmem:[#allocation5 + $0x160] sm:$0xff]  ;;  %v859_v53 = vld [vmem:[#allocation5 + $0x158] sm:$0xff]  ;;  %v850_v55 = vld [vmem:[#allocation5 + $0x110] sm:$0xff] }
  0x1b   :  { %516 = vmatpush.bf16.msra.mxu3 %v844_v15  ;;  %v858_v56 = vld [vmem:[#allocation5 + $0x150] sm:$0xff]  ;;  %v169_v57 = vpack.c.b16 %v162_v54, %v162_v54  ;;  %v849_v58 = vld [vmem:[#allocation5 + $0x108] sm:$0xff]  ;;  %v848_v63 = vld [vmem:[#allocation5 + $0x100] sm:$0xff] }
  0x1c   :  { %478 = vmatpush.bf16.msra.mxu0 %v819_v16  ;;  %v857_v59 = vld [vmem:[#allocation5 + $0x148] sm:$0xff]  ;;  %v48_v60 = vld [vmem:[#allocation2 + $0x10] sm:$0xff]  ;;  %v856_v0 = vld [vmem:[#allocation5 + $0x140] sm:$0xff] }
  0x1d   :  { %491 = vmatpush.bf16.msra.mxu1 %v827_v17  ;;  %v160_v61 = vunpack.c.l.b16 %v48_v60  ;;  %v161_v62 = vunpack.c.h.b16 %v48_v60  ;;  %v870_v9 = vld [vmem:[%s996_s2] ss:$0 sm:$0xff]  ;;  %s961_s2 = smov [#allocation7]  }
  0x1e   :  { %504 = vmatpush.bf16.msra.mxu2 %v835_v18  ;;  %s605_s24 = sshll.u32 %s961_s2, 4  ;;  %s606_s24 = int_to_ptr.vmem [resolvable:$true] %s605_s24 }
  0x1f   :  { %517 = vmatpush.bf16.msra.mxu3 %v843_v19  ;;  %v167_v1 = vpack.c.b16 %v160_v61, %v160_v61  ;;  %v168_v2 = vpack.c.b16 %v161_v62, %v161_v62 }
  0x20   :  { %479 = vmatpush.bf16.msra.mxu0 %v818_v20 }
  0x21   :  { %492 = vmatpush.bf16.msra.mxu1 %v826_v21 }
  0x22   :  { %505 = vmatpush.bf16.msra.mxu2 %v834_v22 }
  0x23   :  { %518 = vmatpush.bf16.msra.mxu3 %v842_v23 }
  0x24   :  { %480 = vmatpush.bf16.msra.mxu0 %v817_v24 }
  0x25   :  { %493 = vmatpush.bf16.msra.mxu1 %v825_v25 }
  0x26   :  { %506 = vmatpush.bf16.msra.mxu2 %v833_v27 }
  0x27   :  { %519 = vmatpush.bf16.msra.mxu3 %v841_v30  ;;  %v585_v30 = vlaneseq }
  0x28   :  { %481 = vmatpush.bf16.msra.mxu0 %v816_v32 }
  0x29   :  { %494 = vmatpush.bf16.msra.mxu1 %v824_v33 }
  0x2a   :  { %507 = vmatpush.bf16.msra.mxu2 %v832_v36 }
  0x2b   :  { %482 = vmatmul.bf16.vlgmr.msra.gmra.mxu0 %v163_v38  ;;  %520 = vmatpush.bf16.msra.mxu3 %v840_v41 }
  0x2c   :  { %526 = vmatpush.bf16.msrb.mxu0 %v855_v34  ;;  %495 = vmatmul.bf16.vlgmr.msra.gmra.mxu1 %v164_v39 }
  0x2d   :  { %539 = vmatpush.bf16.msrb.mxu1 %v863_v35  ;;  %508 = vmatmul.bf16.vlgmr.msra.gmra.mxu2 %v165_v45  ;;  %v586_v35 = vand.u32 127, %v585_v30 }
  0x2e   :  { %559 = vmatpush.bf16.msrb.mxu2 %v864_v42  ;;  %521 = vmatmul.bf16.vlgmr.msra.gmra.mxu3 %v166_v46 }
  0x2f   :  { %vm587_vm5 = vcmp.lt.s32.totalorder %v586_v35, 10 }
  0x30   :  { %527 = vmatpush.bf16.msrb.mxu0 %v854_v43 }
  0x31   :  { %540 = vmatpush.bf16.msrb.mxu1 %v862_v44 }
  0x34   :  { %528 = vmatpush.bf16.msrb.mxu0 %v853_v47 }
  0x35   :  { %541 = vmatpush.bf16.msrb.mxu1 %v861_v48 }
  0x38   :  { %529 = vmatpush.bf16.msrb.mxu0 %v852_v49 }
  0x39   :  { %542 = vmatpush.bf16.msrb.mxu1 %v860_v50 }
  0x3c   :  { %530 = vmatpush.bf16.msrb.mxu0 %v851_v52 }
  0x3d   :  { %543 = vmatpush.bf16.msrb.mxu1 %v859_v53  ;;  %814 = vmatmul.msk.bf16.vlgmr.msrb.gmra.mxu2 %vm470_vm0, %v169_v57 }
  0x40   :  { %531 = vmatpush.bf16.msrb.mxu0 %v850_v55 }
  0x41   :  { %544 = vmatpush.bf16.msrb.mxu1 %v858_v56 }
  0x44   :  { %532 = vmatpush.bf16.msrb.mxu0 %v849_v58 }
  0x45   :  { %545 = vmatpush.bf16.msrb.mxu1 %v857_v59 }
  0x48   :  { %533 = vmatpush.bf16.msrb.mxu0 %v848_v63 }
  0x49   :  { %546 = vmatpush.bf16.msrb.mxu1 %v856_v0 }
  0x4b   :  { %534 = vmatmul.bf16.vlgmr.msrb.gmra.mxu0 %v167_v1 }
  0x4c   :  { %547 = vmatmul.bf16.vlgmr.msrb.gmra.mxu1 %v168_v2 }
  0xa8   :  { %v483_v3 = vpop.f32.mrf.mxu0 }
  0xa9   :  { %v496_v4 = vpop.f32.mrf.mxu1  ;;  %v484_v10 = vadd.f32 %v870_v9, %v483_v3 }
  0xab   :  { %v497_v13 = vadd.f32 %v496_v4, %v484_v10 }
  0xb0   :  { %v485_v5 = vpop.f32.mrf.mxu0  ;;  %v509_v7 = vpop.f32.mrf.mxu2 }
  0xb1   :  { %v498_v6 = vpop.f32.mrf.mxu1  ;;  %v522_v8 = vpop.f32.mrf.mxu3  ;;  %v510_v14 = vadd.f32 %v509_v7, %v497_v13 }
  0xb3   :  { %v523_v16 = vadd.f32 %v522_v8, %v510_v14 }
  0xb8   :  { %v511_v11 = vpop.f32.mrf.mxu2 }
  0xb9   :  { %v524_v12 = vpop.f32.mrf.mxu3 }
  0xc0   :  { %v561_v15 = vpop.f32.mrf.mxu2 }
  0xc8   :  { %v535_v17 = vpop.f32.mrf.mxu0  ;;  %v563_v21 = vpop.f32.mrf.mxu2 }
  0xc9   :  { %v548_v18 = vpop.f32.mrf.mxu1  ;;  %v536_v19 = vadd.f32 %v535_v17, %v523_v16 }
  0xcb   :  { %v549_v20 = vadd.f32 %v548_v18, %v536_v19 }
  0xcd   :  { %v562_v22 = vadd.f32 %v561_v15, %v549_v20 }
  0xcf   :  { %v815_v23 = vmul.f32 -1.442695, %v562_v22 }
  0xd0   :  { %v537_v24 = vpop.f32.mrf.mxu0 }
  0xd1   :  { %v550_v25 = vpop.f32.mrf.mxu1  ;;  %871 = vpow2.f32 %v815_v23 }
  0xd7   :  { %v872_v26 = vpop.eup %871 }
  0xd8   :  { %v568_v27 = vadd.f32 1.0, %v872_v26 }
  0xda   :  { %873 = vrcp.f32 %v568_v27  ;;  %v580_v32 = vand.u32 2147483648, %v568_v27  ;;  %v578_v34 = vand.u32 2147483647, %v568_v27  ;;  %vm574_vm2 = vweird.f32 %v568_v27 }
  0xdc   :  { %v581_v37 = vor.u32 1.1754944e-38, %v580_v32  ;;  %vm579_vm4 = vcmp.eq.f32.partialorder %v578_v34, 8.507059e+37 }
  0xe0   :  { %v874_v28 = vpop.eup %873 }
  0xe1   :  { %v570_v29 = vmul.f32 %v874_v28, %v568_v27  ;;  %vm575_vm1 = vweird.f32 %v874_v28 }
  0xe2   :  { %vm576_vm3 = vmor %vm574_vm2, %vm575_vm1 }
  0xe3   :  { %v571_v31 = vsub.f32 1.0, %v570_v29 }
  0xe5   :  { %v572_v33 = vmul.f32 %v874_v28, %v571_v31 }
  0xe7   :  { %v573_v36 = vadd.f32 %v874_v28, %v572_v33 }
  0xe9   :  { %v577_v38 = vsel %vm576_vm3, %v874_v28, %v573_v36 }
  0xea   :  { %v582_v39 = vsel %vm579_vm4, %v581_v37, %v577_v38 }
  0xeb   :  { %v584_v40 = vmul.f32 %v582_v39, %v562_v22 }
  0xed   :  { %v588_v41 = vsel %vm587_vm5, %v584_v40, -1e+30 }
  0xee   :  { %589 = vmax.xlane.f32.xlu0 %v588_v41 }
 0x161   :  { %v590_v42 = vpop.xlane.xlu0 %589 }
 0x162   :  { %v591_v43 = vsub.f32 %v588_v41, %v590_v42 }
 0x164   :  { %v592_v44 = vmul.f32 1.442695, %v591_v43 }
 0x166   :  { %875 = vpow2.f32 %v592_v44 }
 0x16c   :  { %v876_v45 = vpop.eup %875 }
 0x16d   :  { %594 = vadd.xlane.f32.xlu0 %v876_v45 }
 0x1e0   :  { %v595_v46 = vpop.xlane.xlu0 %594 }
 0x1e1   :  { %877 = vlog2.f32 %v595_v46 }
 0x1e7   :  { %v878_v47 = vpop.eup %877 }
 0x1e8   :  { %v597_v48 = vmul.f32 0.6931472, %v878_v47 }
 0x1ea   :  { %v598_v49 = vsub.f32 %v591_v43, %v597_v48 }
 0x1ec   :  { %599 = vst [vmem:[#allocation7] sm:$0xff] %v598_v49 }
 0x1ed   :  { %610 = dma.vmem_to_hbm [thread:$0]  %s606_s24, 128, %s608_s27, [#allocation4]  }
 0x1ee   :  { %955 = dma.done.wait [#allocation4], 128  }
 0x1ef   :  { %956 = vsyncadd [#allocation4], 4294967168 }
 0x1f0   :  { %615 = vsyncpa [#allocation3], 1 }
 0x1f1   :  { %616 = vsyncpa [#allocation6], 1 }
 0x1f2   :  { %617 = vsyncpa [#allocation4], 1 }

</bundles_post_ra>
